<compile_context>
chip_gen: v5e
topology: v5e:2x2
jax: 0.10.0
libtpu: 0.0.40
codegen_flags: <defaults>
</compile_context>

<pallas_src>
import functools

import jax
import jax.numpy as jnp
from jax.experimental import pallas as pl
from jax.experimental.pallas import tpu as pltpu


_VMEM_LIMIT = 48 * 1024 * 1024   # safe on v7x (64 MiB phys) and v5e/v6e (128 MiB)
_BLOCK_BYTES = 8 << 20           # ~8 MiB of f32 data per input block


# ----------------------------------------------------------------------------
# Helpers
# ----------------------------------------------------------------------------
def _fold_rows(v, out_rows):
    """Sum a (BR, L) block down to (out_rows, L) with a pairwise add tree."""
    rows = v.shape[0]
    if rows == out_rows:
        return v
    parts = [v[i * out_rows:(i + 1) * out_rows] for i in range(rows // out_rows)]
    while len(parts) > 1:
        nxt = [parts[i] + parts[i + 1] for i in range(0, len(parts) - 1, 2)]
        if len(parts) % 2:
            nxt.append(parts[-1])
        parts = nxt
    return parts[0]


# ----------------------------------------------------------------------------
# Kernels
# ----------------------------------------------------------------------------
def _ce_kernel(*refs, ignore_index, tail_lanes, weighted):
    """Weighted / unweighted cross-entropy partial sums.

    x_ref : (C, TL) logits for one image / pixel tile
    t_ref : (1, TL) integer targets
    w_ref : (C, 1)  class weights (only when weighted)
    loss_ref / wsum_ref : (1, TL) lane-dense VMEM-resident accumulators
    """
    if weighted:
        x_ref, t_ref, w_ref, loss_ref, wsum_ref = refs
    else:
        x_ref, t_ref, loss_ref, wsum_ref = refs
        w_ref = None

    i = pl.program_id(0)   # image index
    p = pl.program_id(1)   # pixel-block index

    @pl.when((i == 0) & (p == 0))
    def _init():
        loss_ref[...] = jnp.zeros_like(loss_ref)
        wsum_ref[...] = jnp.zeros_like(wsum_ref)

    x = x_ref[...].astype(jnp.float32)            # (C, TL)
    t = t_ref[...].astype(jnp.int32)              # (1, TL)
    c_dim, tl = x.shape

    def accum(lane_mask):
        valid = t != ignore_index
        if lane_mask is not None:
            valid = valid & lane_mask

        cls = jax.lax.broadcasted_iota(jnp.int32, (c_dim, tl), 0)
        onehot = (cls == t).astype(jnp.float32)                    # (C, TL)

        m = jnp.max(x, axis=0, keepdims=True)                      # (1, TL)
        lse = m + jnp.log(jnp.sum(jnp.exp(x - m), axis=0, keepdims=True))
        tgt_logit = jnp.sum(x * onehot, axis=0, keepdims=True)     # (1, TL)
        nll = lse - tgt_logit

        if weighted:
            wts = w_ref[...].astype(jnp.float32)                   # (C, 1)
            tgt_w = jnp.sum(wts * onehot, axis=0, keepdims=True)   # (1, TL)
            loss_ref[...] += jnp.where(valid, nll * tgt_w, 0.0)
            wsum_ref[...] += jnp.where(valid, tgt_w, 0.0)
        else:
            loss_ref[...] += jnp.where(valid, nll, 0.0)
            wsum_ref[...] += valid.astype(jnp.float32)

    if tail_lanes == 0:
        accum(None)                                 # steady state: no iota mask
    else:
        last = pl.num_programs(1) - 1

        @pl.when(p < last)
        def _interior():
            accum(None)

        @pl.when(p == last)
        def _tail():
            lane = jax.lax.broadcasted_iota(jnp.int32, (1, tl), 1)
            accum(lane < tail_lanes)


def _bce_kernel(x_ref, t_ref, loss_ref, cnt_ref, *,
                ignore_index, a_rows, tail_rows):
    """BCE-with-logits masked partial sums over a (BR, L) lane-dense block."""
    s = pl.program_id(0)

    @pl.when(s == 0)
    def _init():
        loss_ref[...] = jnp.zeros_like(loss_ref)
        cnt_ref[...] = jnp.zeros_like(cnt_ref)

    x = x_ref[...].astype(jnp.float32)            # (BR, L)
    t = t_ref[...].astype(jnp.int32)              # (BR, L)

    def accum(row_mask):
        valid = t != ignore_index
        if row_mask is not None:
            valid = valid & row_mask
        y = jnp.where(valid, t, 0).astype(jnp.float32)
        # Stable BCE with logits; log(1+z) vs log1p(z) differs by < 1e-7 abs
        # here (z = exp(-|x|) <= 1) and drops the small-z branch from the
        # hot path.
        softplus = jnp.log(1.0 + jnp.exp(-jnp.abs(x)))
        per = jnp.maximum(x, 0.0) - x * y + softplus
        loss_ref[...] += _fold_rows(jnp.where(valid, per, 0.0), a_rows)
        cnt_ref[...] += _fold_rows(valid.astype(jnp.float32), a_rows)

    if tail_rows == 0:
        accum(None)
    else:
        last = pl.num_programs(0) - 1

        @pl.when(s < last)
        def _interior():
            accum(None)

        @pl.when(s == last)
        def _tail():
            row = jax.lax.broadcasted_iota(jnp.int32, x.shape, 0)
            accum(row < tail_rows)


def _biou_kernel(x_ref, t_ref, inter_ref, ssum_ref, ysum_ref, *,
                 ignore_index, a_rows, tail_rows):
    """Soft-IoU partial sums (intersection, sum(sigmoid), sum(targets))."""
    s = pl.program_id(0)

    @pl.when(s == 0)
    def _init():
        inter_ref[...] = jnp.zeros_like(inter_ref)
        ssum_ref[...] = jnp.zeros_like(ssum_ref)
        ysum_ref[...] = jnp.zeros_like(ysum_ref)

    x = x_ref[...].astype(jnp.float32)            # (BR, L)
    t = t_ref[...].astype(jnp.int32)              # (BR, L)

    def accum(row_mask):
        valid = t != ignore_index
        if row_mask is not None:
            valid = valid & row_mask
        y = jnp.where(valid, t, 0).astype(jnp.float32)
        sig = jnp.where(valid, 1.0 / (1.0 + jnp.exp(-x)), 0.0)
        inter_ref[...] += _fold_rows(sig * y, a_rows)
        ssum_ref[...] += _fold_rows(sig, a_rows)
        ysum_ref[...] += _fold_rows(y, a_rows)

    if tail_rows == 0:
        accum(None)
    else:
        last = pl.num_programs(0) - 1

        @pl.when(s < last)
        def _interior():
            accum(None)

        @pl.when(s == last)
        def _tail():
            row = jax.lax.broadcasted_iota(jnp.int32, x.shape, 0)
            accum(row < tail_rows)


# ----------------------------------------------------------------------------
# Wrappers
# ----------------------------------------------------------------------------
def ce_loss(inputs_nchw, targets_nhw, ignore_index=-1, weights=None):
    n, c, h, w = inputs_nchw.shape
    hw = h * w
    x = inputs_nchw.reshape(n, c, hw)             # free (contiguous) view
    t = targets_nhw.reshape(n, 1, hw)             # free view
    if not jnp.issubdtype(t.dtype, jnp.integer):
        t = t.astype(jnp.int32)

    # Pixel-lane tile: ~8 MiB of logits per block, lanes a multiple of 128
    # (or the full spatial extent for small images).
    tl = max(128, (_BLOCK_BYTES // (max(c, 1) * 4)) // 128 * 128)
    tl = hw if hw <= tl else tl
    pbt = pl.cdiv(hw, tl)
    tail_lanes = hw % tl                           # 0 => no boundary masking

    weighted = weights is not None
    kernel = functools.partial(_ce_kernel, ignore_index=ignore_index,
                               tail_lanes=tail_lanes, weighted=weighted)

    in_specs = [
        pl.BlockSpec((None, c, tl), lambda i, p: (i, 0, p)),
        pl.BlockSpec((None, 1, tl), lambda i, p: (i, 0, p)),
    ]
    args = [x, t]
    if weighted:
        in_specs.append(pl.BlockSpec((c, 1), lambda i, p: (0, 0)))
        args.append(weights.astype(jnp.float32).reshape(c, 1))

    acc = jax.ShapeDtypeStruct((1, tl), jnp.float32)
    loss_p, w_p = pl.pallas_call(
        kernel,
        out_shape=(acc, acc),
        grid=(n, pbt),
        in_specs=in_specs,
        out_specs=(
            pl.BlockSpec((1, tl), lambda i, p: (0, 0)),
            pl.BlockSpec((1, tl), lambda i, p: (0, 0)),
        ),
        compiler_params=pltpu.CompilerParams(
            dimension_semantics=("arbitrary", "arbitrary"),
            vmem_limit_bytes=_VMEM_LIMIT),
    )(*args)
    # Note: divides by zero (NaN/Inf) if every pixel is ignored -- matches torch.
    return jnp.sum(loss_p) / jnp.sum(w_p)


def _binary_view(inputs, targets):
    """Mirror CustomLoss.validate_and_filter_binary shape handling; return a
    zero-copy lane-dense 2-D (rows, lanes) view of inputs / targets."""
    if inputs.shape != targets.shape:
        if not (inputs.ndim == 4 and inputs.shape[1] == 1
                and inputs.shape[-2:] == targets.shape[-2:]):
            raise ValueError(
                f"Inputs and targets must have compatible shape, got "
                f"{inputs.shape} and {targets.shape}")
        inputs = inputs.reshape(targets.shape)   # drop singleton channel (free)

    lanes = targets.shape[-1]
    if lanes < 128 and targets.ndim >= 2:
        lanes = targets.shape[-1] * targets.shape[-2]   # fold H*W (lane-dense)
    rows = targets.size // lanes

    x = inputs.reshape(rows, lanes)
    t = targets.reshape(rows, lanes)
    if not jnp.issubdtype(t.dtype, jnp.integer):
        t = t.astype(jnp.int32)
    return x, t


def _run_binary(kernel_fn, n_out, inputs, targets, ignore_index):
    x, t = _binary_view(inputs, targets)
    rows, lanes = x.shape

    # ~8 MiB of f32 per input block; with vmem_limit_bytes=48 MiB the
    # double-buffered logits + targets fit on every chip generation.
    br = min(rows, max(8, _BLOCK_BYTES // (lanes * 4)))
    if br < rows:
        br = (br // 8) * 8                        # partial blocks: sublane aligned
    nb = pl.cdiv(rows, br)
    tail_rows = rows % br                         # 0 => no boundary masking

    # Accumulator rows: multiple of 8 (or the whole block when tiny), sized so
    # the in-kernel tree-fold fan-in stays <= 64.
    if br % 8 == 0:
        a_rows = 8
        while br // a_rows > 64 and br % (a_rows * 2) == 0:
            a_rows *= 2
    else:
        a_rows = br

    acc = jax.ShapeDtypeStruct((a_rows, lanes), jnp.float32)
    outs = pl.pallas_call(
        functools.partial(kernel_fn, ignore_index=ignore_index,
                          a_rows=a_rows, tail_rows=tail_rows),
        out_shape=tuple(acc for _ in range(n_out)),
        grid=(nb,),
        in_specs=[
            pl.BlockSpec((br, lanes), lambda s: (s, 0)),
            pl.BlockSpec((br, lanes), lambda s: (s, 0)),
        ],
        out_specs=tuple(
            pl.BlockSpec((a_rows, lanes), lambda s: (0, 0))
            for _ in range(n_out)),
        compiler_params=pltpu.CompilerParams(
            dimension_semantics=("arbitrary",),
            vmem_limit_bytes=_VMEM_LIMIT),
    )(x, t)
    return [jnp.sum(o) for o in outs]


def bce_loss(inputs, targets, ignore_index=-1):
    # TODO(synk): PyTorch allows an element-wise `weight` for BCE on the
    # filtered (dynamic-shape) tensor; no clean static-shape equivalent here.
    loss_sum, cnt = _run_binary(_bce_kernel, 2, inputs, targets, ignore_index)
    return loss_sum / cnt


def biou_loss(inputs, targets, ignore_index=-1, smooth=1):
    inter, ssum, ysum = _run_binary(_biou_kernel, 3, inputs, targets, ignore_index)
    union = ssum + ysum - inter
    return 1.0 - (inter + smooth) / (union + smooth)


def custom_loss(inputs, targets, mode="ce", ignored_index=-1, ce_weights=None):
    if mode not in ("ce", "bce", "biou"):
        raise ValueError(f"Invalid loss type: {mode}")
    if mode == "bce":
        return bce_loss(inputs, targets, ignored_index)
    if mode == "biou":
        return biou_loss(inputs, targets, ignored_index)
    return ce_loss(inputs, targets, ignored_index, ce_weights)


# ----------------------------------------------------------------------------
# Pure-JAX references (for correctness check only)
# ----------------------------------------------------------------------------
def _ce_ref(inputs_nchw, targets_nhw, weights, ignore=-1):
    n, c, h, w = inputs_nchw.shape
    logits = jnp.transpose(inputs_nchw, (0, 2, 3, 1)).reshape(-1, c)
    t = targets_nhw.reshape(-1)
    valid = (t != ignore)
    tc = jnp.where(valid, t, 0)
    lse = jax.scipy.special.logsumexp(logits, axis=1)
    tl = jnp.take_along_axis(logits, tc[:, None], axis=1)[:, 0]
    wt = weights[tc]
    per = (lse - tl) * wt * valid
    return per.sum() / (wt * valid).sum()


def _bce_ref(inputs, targets, ignore=-1):
    x = inputs[:, 0].reshape(-1)
    t = targets.reshape(-1)
    valid = (t != ignore)
    y = jnp.where(valid, t, 0).astype(jnp.float32)
    per = jnp.maximum(x, 0.0) - x * y + jnp.log1p(jnp.exp(-jnp.abs(x)))
    return jnp.sum(per * valid) / jnp.sum(valid)


def _biou_ref(inputs, targets, ignore=-1, smooth=1):
    x = inputs[:, 0].reshape(-1)
    t = targets.reshape(-1)
    valid = (t != ignore)
    y = jnp.where(valid, t, 0).astype(jnp.float32)
    s = jax.nn.sigmoid(x) * valid
    inter = jnp.sum(s * y)
    union = jnp.sum(s) + jnp.sum(y) - inter
    return 1.0 - (inter + smooth) / (union + smooth)


# ----------------------------------------------------------------------------
if __name__ == "__main__":
    key = jax.random.PRNGKey(0)
    k1, k2, k3, k4 = jax.random.split(key, 4)

    N, C, H, W = 2, 4, 16, 16

    # ---- ce mode: inputs (N, C, H, W), targets (N, H, W) with ignore=-1 ----
    ce_inputs = jax.random.normal(k1, (N, C, H, W), jnp.float32)
    ce_targets = jax.random.randint(k2, (N, H, W), -1, C)      # includes ignored -1
    ce_weights = jnp.array([1.0, 2.0, 0.5, 1.5], jnp.float32)  # deterministic init

    # ---- bce / biou modes: inputs (N, 1, H, W), binary targets with ignore ----
    bin_inputs = jax.random.normal(k3, (N, 1, H, W), jnp.float32)
    bin_targets = jax.random.randint(k4, (N, H, W), -1, 2)     # in {-1, 0, 1}

    ce = jax.block_until_ready(custom_loss(ce_inputs, ce_targets, "ce", -1, ce_weights))
    ce_u = jax.block_until_ready(custom_loss(ce_inputs, ce_targets, "ce", -1, None))
    bce = jax.block_until_ready(custom_loss(bin_inputs, bin_targets, "bce", -1))
    biou = jax.block_until_ready(custom_loss(bin_inputs, bin_targets, "biou", -1))

    ce_r = _ce_ref(ce_inputs, ce_targets, ce_weights)
    ce_u_r = _ce_ref(ce_inputs, ce_targets, jnp.ones((C,), jnp.float32))
    bce_r = _bce_ref(bin_inputs, bin_targets)
    biou_r = _biou_ref(bin_inputs, bin_targets)

    assert jnp.allclose(ce, ce_r, atol=1e-4, rtol=1e-4), (ce, ce_r)
    assert jnp.allclose(ce_u, ce_u_r, atol=1e-4, rtol=1e-4), (ce_u, ce_u_r)
    assert jnp.allclose(bce, bce_r, atol=1e-4, rtol=1e-4), (bce, bce_r)
    assert jnp.allclose(biou, biou_r, atol=1e-4, rtol=1e-4), (biou, biou_r)

    print("KERNEL_OK")
</pallas_src>

<mosaic_0001>
module attributes {stable_mosaic.version = 11 : i64} {
  func.func @_ce_kernel(%arg0: i32, %arg1: i32, %arg2: memref<1x4x256xf32, #tpu.memory_space<vmem>>, %arg3: memref<1x1x256xi32, #tpu.memory_space<vmem>>, %arg4: memref<4x1xf32, #tpu.memory_space<vmem>>, %arg5: memref<1x256xf32, #tpu.memory_space<vmem>>, %arg6: memref<1x256xf32, #tpu.memory_space<vmem>>) attributes {dimension_semantics = [#tpu.dimension_semantics<arbitrary>, #tpu.dimension_semantics<arbitrary>], iteration_bounds = array<i64: 2, 1>, scalar_prefetch = 0 : i64, scratch_operands = 0 : i64, tpu.core_type = #tpu.core_type<tc>, window_params = [{transform_indices = @transform_0, window_bounds = array<i64: 1, 4, 256>}, {transform_indices = @transform_1, window_bounds = array<i64: 1, 1, 256>}, {pipeline_mode = #tpu.pipeline_mode<synchronous>, transform_indices = @transform_2, window_bounds = array<i64: 4, 1>}, {pipeline_mode = #tpu.pipeline_mode<synchronous>, transform_indices = @transform_3, window_bounds = array<i64: 1, 256>}, {pipeline_mode = #tpu.pipeline_mode<synchronous>, transform_indices = @transform_4, window_bounds = array<i64: 1, 256>}]} {
    %c0_i32 = arith.constant 0 : i32
    %0 = arith.cmpi eq, %arg0, %c0_i32 : i32
    %c0_i32_0 = arith.constant 0 : i32
    %1 = arith.cmpi eq, %arg1, %c0_i32_0 : i32
    %2 = arith.andi %0, %1 : i1
    %3 = arith.extui %2 : i1 to i32
    %c0_i32_1 = arith.constant 0 : i32
    %4 = arith.cmpi ne, %3, %c0_i32_1 : i32
    scf.if %4 {
      %cst_22 = arith.constant 0.000000e+00 : f32
      %45 = vector.broadcast %cst_22 : f32 to vector<1x256xf32>
      %c0_23 = arith.constant 0 : index
      %c0_24 = arith.constant 0 : index
      %46 = vector.load %arg5[%c0_23, %c0_24] : memref<1x256xf32, #tpu.memory_space<vmem>>, vector<1x256xf32>
      tpu.vector_store %arg5[%c0_23, %c0_24], %45 {strides = array<i32>} : memref<1x256xf32, #tpu.memory_space<vmem>>, vector<1x256xf32>,
      %cst_25 = arith.constant 0.000000e+00 : f32
      %47 = vector.broadcast %cst_25 : f32 to vector<1x256xf32>
      %c0_26 = arith.constant 0 : index
      %c0_27 = arith.constant 0 : index
      %48 = vector.load %arg6[%c0_26, %c0_27] : memref<1x256xf32, #tpu.memory_space<vmem>>, vector<1x256xf32>
      tpu.vector_store %arg6[%c0_26, %c0_27], %47 {strides = array<i32>} : memref<1x256xf32, #tpu.memory_space<vmem>>, vector<1x256xf32>,
    } else {
    }
    %c0 = arith.constant 0 : index
    %c0_2 = arith.constant 0 : index
    %c0_3 = arith.constant 0 : index
    %5 = vector.load %arg2[%c0, %c0_2, %c0_3] : memref<1x4x256xf32, #tpu.memory_space<vmem>>, vector<1x4x256xf32>
    %6 = vector.shape_cast %5 : vector<1x4x256xf32> to vector<4x256xf32>
    %c0_4 = arith.constant 0 : index
    %c0_5 = arith.constant 0 : index
    %c0_6 = arith.constant 0 : index
    %7 = vector.load %arg3[%c0_4, %c0_5, %c0_6] : memref<1x1x256xi32, #tpu.memory_space<vmem>>, vector<1x1x256xi32>
    %8 = vector.shape_cast %7 : vector<1x1x256xi32> to vector<1x256xi32>
    %c-1_i32 = arith.constant -1 : i32
    %9 = vector.broadcast %c-1_i32 : i32 to vector<1x256xi32>
    %10 = arith.cmpi ne, %8, %9 : vector<1x256xi32>
    %11 = tpu.iota {dimensions = array<i32: 0>} : vector<4x256xi32>
    %12 = vector.broadcast %8 : vector<1x256xi32> to vector<4x256xi32>
    %13 = arith.cmpi eq, %11, %12 : vector<4x256xi32>
    %14 = arith.extui %13 : vector<4x256xi1> to vector<4x256xi32>
    %15 = arith.sitofp %14 : vector<4x256xi32> to vector<4x256xf32>
    %cst = arith.constant dense<0xFF800000> : vector<256xf32>
    %16 = vector.multi_reduction <maximumf>, %6, %cst [0] : vector<4x256xf32> to vector<256xf32>
    %17 = vector.shape_cast %16 : vector<256xf32> to vector<1x256xf32>
    %18 = vector.broadcast %17 : vector<1x256xf32> to vector<4x256xf32>
    %19 = arith.subf %6, %18 : vector<4x256xf32>
    %20 = math.exp %19 : vector<4x256xf32>
    %cst_7 = arith.constant dense<0.000000e+00> : vector<256xf32>
    %21 = vector.multi_reduction <add>, %20, %cst_7 [0] : vector<4x256xf32> to vector<256xf32>
    %22 = vector.shape_cast %21 : vector<256xf32> to vector<1x256xf32>
    %23 = math.log %22 : vector<1x256xf32>
    %24 = arith.addf %17, %23 : vector<1x256xf32>
    %25 = arith.mulf %6, %15 : vector<4x256xf32>
    %cst_8 = arith.constant dense<0.000000e+00> : vector<256xf32>
    %26 = vector.multi_reduction <add>, %25, %cst_8 [0] : vector<4x256xf32> to vector<256xf32>
    %27 = vector.shape_cast %26 : vector<256xf32> to vector<1x256xf32>
    %28 = arith.subf %24, %27 : vector<1x256xf32>
    %c0_9 = arith.constant 0 : index
    %c0_10 = arith.constant 0 : index
    %29 = vector.load %arg4[%c0_9, %c0_10] : memref<4x1xf32, #tpu.memory_space<vmem>>, vector<4x1xf32>
    %30 = vector.broadcast %29 : vector<4x1xf32> to vector<4x256xf32>
    %31 = arith.mulf %30, %15 : vector<4x256xf32>
    %cst_11 = arith.constant dense<0.000000e+00> : vector<256xf32>
    %32 = vector.multi_reduction <add>, %31, %cst_11 [0] : vector<4x256xf32> to vector<256xf32>
    %33 = vector.shape_cast %32 : vector<256xf32> to vector<1x256xf32>
    %c0_12 = arith.constant 0 : index
    %c0_13 = arith.constant 0 : index
    %34 = vector.load %arg5[%c0_12, %c0_13] : memref<1x256xf32, #tpu.memory_space<vmem>>, vector<1x256xf32>
    %35 = arith.mulf %28, %33 : vector<1x256xf32>
    %cst_14 = arith.constant 0.000000e+00 : f32
    %36 = vector.broadcast %cst_14 : f32 to vector<1x256xf32>
    %37 = arith.select %10, %35, %36 : vector<1x256xi1>, vector<1x256xf32>
    %38 = arith.addf %34, %37 : vector<1x256xf32>
    %c0_15 = arith.constant 0 : index
    %c0_16 = arith.constant 0 : index
    %39 = vector.load %arg5[%c0_15, %c0_16] : memref<1x256xf32, #tpu.memory_space<vmem>>, vector<1x256xf32>
    tpu.vector_store %arg5[%c0_15, %c0_16], %38 {strides = array<i32>} : memref<1x256xf32, #tpu.memory_space<vmem>>, vector<1x256xf32>,
    %c0_17 = arith.constant 0 : index
    %c0_18 = arith.constant 0 : index
    %40 = vector.load %arg6[%c0_17, %c0_18] : memref<1x256xf32, #tpu.memory_space<vmem>>, vector<1x256xf32>
    %cst_19 = arith.constant 0.000000e+00 : f32
    %41 = vector.broadcast %cst_19 : f32 to vector<1x256xf32>
    %42 = arith.select %10, %33, %41 : vector<1x256xi1>, vector<1x256xf32>
    %43 = arith.addf %40, %42 : vector<1x256xf32>
    %c0_20 = arith.constant 0 : index
    %c0_21 = arith.constant 0 : index
    %44 = vector.load %arg6[%c0_20, %c0_21] : memref<1x256xf32, #tpu.memory_space<vmem>>, vector<1x256xf32>
    tpu.vector_store %arg6[%c0_20, %c0_21], %43 {strides = array<i32>} : memref<1x256xf32, #tpu.memory_space<vmem>>, vector<1x256xf32>,
    return
  }
  func.func @transform_0(%arg0: i32, %arg1: i32) -> (i32, i32, i32) {
    %c0_i32 = arith.constant 0 : i32
    %c0_i32_0 = arith.constant 0 : i32
    return %arg0, %c0_i32, %arg1 : i32, i32, i32
  }
  func.func @transform_1(%arg0: i32, %arg1: i32) -> (i32, i32, i32) {
    %c0_i32 = arith.constant 0 : i32
    %c0_i32_0 = arith.constant 0 : i32
    return %arg0, %c0_i32, %arg1 : i32, i32, i32
  }
  func.func @transform_2(%arg0: i32, %arg1: i32) -> (i32, i32) {
    %c0_i32 = arith.constant 0 : i32
    %c0_i32_0 = arith.constant 0 : i32
    %c0_i32_1 = arith.constant 0 : i32
    return %c0_i32, %c0_i32_0 : i32, i32
  }
  func.func @transform_3(%arg0: i32, %arg1: i32) -> (i32, i32) {
    %c0_i32 = arith.constant 0 : i32
    %c0_i32_0 = arith.constant 0 : i32
    %c0_i32_1 = arith.constant 0 : i32
    return %c0_i32, %c0_i32_0 : i32, i32
  }
  func.func @transform_4(%arg0: i32, %arg1: i32) -> (i32, i32) {
    %c0_i32 = arith.constant 0 : i32
    %c0_i32_0 = arith.constant 0 : i32
    %c0_i32_1 = arith.constant 0 : i32
    return %c0_i32, %c0_i32_0 : i32, i32
  }
}

</mosaic_0001>

<bundles_post_ra>
// kernel: tpu_custom_call.1
= control target key start
LH: loop header
LB: loop body
LE: loop exit
PB: predicated region body
PF: predicated region fallthrough
CT: control target
= control target key end

     0   :  { %10 = vsyncpa [#allocation3], 0  ;;  %s945_s0 = inlined_call_operand.hbm [shape: f32[2,4,256], index: 0, kind: input, shape index: {}]   ;;  %s946_s1 = inlined_call_operand.vmem [shape: s32[2,1,256], index: 1, kind: input, shape index: {}]   ;;  %s947_s2 = inlined_call_operand.vmem [shape: f32[4,1], index: 2, kind: input, shape index: {}]   ;;  %s948_s3 = inlined_call_operand.hbm [shape: f32[1,256], index: 3, kind: output, shape index: {0}]   ;;  %s949_s4 = inlined_call_operand.hbm [shape: f32[1,256], index: 4, kind: output, shape index: {1}]  }
   0x1   :  { %12 = vsyncpa [#allocation3 + $0x1], 0 }
   0x2   :  { %13 = vsyncpa [#allocation4], 0 }
   0x3   :  { %14 = vsyncpa [#allocation7], 0  ;;  %s793_s15 = smov 0   ;;  %s795_s16 = smov 0  }
   0x4   :  { %s797_s17 = smov 0   ;;  %s799_s18 = smov 0  }
   0x5   :  { %s801_s19 = smov 0   ;;  %s803_s20 = smov 0  }
   0x6 LB: > { %s518_s21 = sadd.s32 4294967295, %s761_s20   ;;  %s32_s22 = sadd.s32 1, %s757_s19  ;;  %s761_s20 = sphi %s803_s20, %s20_s20   ;;  %s757_s19 = sphi %s801_s19, %s957_s19   ;;  %s753_s18 = sphi %s799_s18, %s956_s18   ;;  %s749_s17 = sphi %s797_s17, %s955_s17   ;;  %s745_s16 = sphi %s795_s16, %s954_s16   ;;  %s741_s15 = sphi %s793_s15, %s953_s15  }
   0x7   : > { %p34_p0 = scmp.ge.s32.totalorder %s32_s22, 2  ;;  %s41_s23 = sadd.s32 1, %s749_s17 }
   0x8   : > { %p48_p1 = scmp.ne.s32.totalorder %s749_s17, %s745_s16  ;;  %p49_p2 = scmp.eq.s32.totalorder %s761_s20, 0 }
   0x9   : > { %s959_s22 = smov (%p34_p0, %s32_s22), 0  ;;  %p54_p4 = scmp.ne.s32.totalorder %s745_s16, %s741_s15 }
   0xa   : > { %p829_p3 = por %p49_p2, %p48_p1  ;;  %s36_s25 = ssub.s32 %s757_s19, %s959_s22 }
   0xb   : > { %p55_p5 = scmp.eq.s32.totalorder %s518_s21, 0  ;;  %p39_p6 = scmp.eq.s32.totalorder %s36_s25, 0 }
   0xc   : > { %p552_p8 = scmp.lt.s32.totalorder %s761_s20, 2  ;;  %s172_s28 = sand.u32 1, %s749_s17  }
   0xd   : > { %p838_p7 = por %p55_p5, %p54_p4  ;;  %s536_s29 = sshll.u32 %s757_s19, 3 }
   0xe   : > { %s844_s27 = scalar_select %p39_p6, %s749_s17, %s41_s23  }
   0xf   : > { %s521_s30 = sshll.u32 %s172_s28, 3  ;;  %s183_s7 = scalar_lea.hbm %s945_s0, %s536_s29 }
  0x10   : > { %s185_s8 = sshll.u32 %s183_s7, 4  ;;  %s176_s9 = scalar_lea.vmem [#allocation2], %s521_s30  ;;  %s186_s8 = int_to_ptr.hbm [resolvable:$true] %s185_s8 }
  0x11   : > { %s187_s10 = sshll.u32 %s176_s9, 4  ;;  %p549_p9 = pnand %p552_p8, %p829_p3  ;;  %s188_s10 = int_to_ptr.vmem [resolvable:$true] %s187_s10 }
  0x12   : > { %p524_p10 = scmp.ge.s32.totalorder %s761_s20, 1  ;;  %p204_p11 = scmp.lt.s32.totalorder %s761_s20, 3 }
  0x13   : > { %s173_s11 = scalar_lea.sflag [#allocation3], %s172_s28 }
  0x14   : > { %551 = dma.hbm_to_vmem [thread:$0]  (!%p549_p9), %s186_s8, 128, %s188_s10, %s173_s11  }
  0x15   : > { %p205_p12 = pnand %p524_p10, %p204_p11 }
  0x16   : > { %s210_s12 = sand.u32 (!%p205_p12), 1, %s745_s16  }
  0x17   : > { %208 = sbr.rel (%p205_p12) target bundleno = 182 (0xb6), region = 32  ;;  %s525_s13 = sshll.u32 (!%p205_p12), %s210_s12, 3 }
  0x18   : > { %s211_s14 = scalar_lea.sflag (!%p205_p12), [#allocation3], %s210_s12  ;;  %s214_s15 = scalar_lea.vmem (!%p205_p12), [#allocation2], %s525_s13 }
  0x1c   : > { %728 = dma.done.wait (%p838_p7), %s211_s14, 128  }
  0x1d   : > { %730 = vsyncadd (%p838_p7), %s211_s14, 4294967168  ;;  %p245_p13 = scmp.lt.s32.totalorder %s753_s18, 1  ;;  %p253_p0 = scmp.eq.s32.totalorder %s753_s18, 0 }
  0x1e   : > { %v259_v0 = vlaneseq (%p253_p0)  ;;  %v763_v1 = vmov (%p253_p0), 0.0  }
  0x1f   : > { %s961_s18 = smov (!%p245_p13, %s753_s18), 1  ;;  %258 = sbr.rel (!%p253_p0) target bundleno = 36 (0x24), region = 40 }
  0x20   : > { %s526_s23 = sshll.u32 %s961_s18, 1  ;;  %vm261_vm0 = vcmp.lt.s32.totalorder (%p253_p0), %v259_v0, 256 }
  0x21   : > { %s866_s28 = scalar_lea.vmem %s946_s1, %s526_s23  ;;  %263 = vst.msk [vmem:[#allocation5] sm:$0x3] (%p253_p0), %vm261_vm0, %v763_v1 }
  0x22   : > { %264 = vst.msk [vmem:[#allocation6] sm:$0x3] (%p253_p0), %vm261_vm0, %v763_v1 }
  0x24 PF: > { %v361_v2 = vld [vmem:[%s947_s2] sm:$0xf]  ;;  %v764_v3 = vmov 0   ;;  %v265_v4 = vld [vmem:[%s214_s15] sm:$0xff]  ;;  %vm284_vm1 = vcmask 1043456   ;;  %v268_v26 = vlaneseq  ;;  %v765_v31 = vmov 0.0  }
  0x25   : > { %610 = vset.pattern.permute.xlu0 %v764_v3  ;;  %279 = vst [vmem:[#allocation1] ss:$2 sm:$0xff] %v265_v4  ;;  %v881_v27 = vld [vmem:[%s866_s28] sm:$0x3]  ;;  %vm389_vm4 = vcmask 1040384   ;;  %s766_s18 = smov [#allocation6]  }
  0x26   : > { %364 = vperm.xlu0 %610, %v361_v2   ;;  %v269_v28 = vshrl.u32 %v268_v26, 7  ;;  %v271_v29 = vperm.slane %v881_v27, 1  ;;  %v270_v30 = vperm.slane %v881_v27, 0  ;;  %vm267_vm5 = vcmp.ne.s32.totalorder %v881_v27, 4294967295  ;;  %s426_s30 = sshll.u32 %s766_s18, 4  ;;  %s428_s7 = sshll.u32 %s949_s4, 4  ;;  %s427_s30 = int_to_ptr.vmem [resolvable:$true] %s426_s30  ;;  %s429_s7 = int_to_ptr.hbm [resolvable:$true] %s428_s7 }
  0x27   : > { %p901_p1 = scmp.eq.s32.totalorder %s518_s21, 1  ;;  %vm396_vm6 = vcmp.lt.s32.totalorder %v268_v26, 256  ;;  %s767_s9 = smov [#allocation5]  }
  0x28   : > { %vm273_vm2 = vcmp.eq.s32.totalorder %v269_v28, %v271_v29  ;;  %vm272_vm3 = vcmp.eq.s32.totalorder %v269_v28, %v270_v30  ;;  %s414_s10 = sshll.u32 %s767_s9, 4  ;;  %s416_s13 = sshll.u32 %s948_s3, 4  ;;  %s415_s10 = int_to_ptr.vmem [resolvable:$true] %s414_s10  ;;  %s417_s13 = int_to_ptr.hbm [resolvable:$true] %s416_s13 }
  0x29   : > { %v529_v32 = vsel %vm273_vm2, 1.0, %v765_v31  ;;  %v528_v34 = vsel %vm272_vm3, 1.0, %v765_v31 }
  0x2a   : > { %v335_v33 = vrot.slane %v529_v32, 4 }
  0x2c   : > { %v281_v5 = vld.sshfl [vmem:[#allocation1 + $0x8] sm:$0xff pattern:$0x75316420]  ;;  %v280_v7 = vld.sshfl [vmem:[#allocation1] sm:$0xff pattern:$0x75316420]  ;;  %v336_v35 = vsel %vm284_vm1, %v528_v34, %v335_v33 }
  0x2d   : > { %v292_v6 = vsel %vm284_vm1, %v281_v5, -inf  ;;  %v285_v9 = vsel %vm284_vm1, %v280_v7, -inf  ;;  %v338_v36 = vmul.f32 %v336_v35, %v265_v4 }
  0x2e   : > { %v293_v8 = vrot.slane %v292_v6, 4  ;;  %v286_v10 = vrot.slane %v285_v9, 4 }
  0x30   : > { %v294_v11 = vmax.f32 %v292_v6, %v293_v8  ;;  %v287_v12 = vmax.f32 %v285_v9, %v286_v10 }
  0x32   : > { %v295_v13 = vrot.slane %v294_v11, 2  ;;  %v288_v14 = vrot.slane %v287_v12, 2 }
  0x34   : > { %v296_v15 = vmax.f32 %v294_v11, %v295_v13  ;;  %v289_v16 = vmax.f32 %v287_v12, %v288_v14 }
  0x36   : > { %v297_v17 = vrot.slane %v296_v15, 1  ;;  %v290_v18 = vrot.slane %v289_v16, 1 }
  0x38   : > { %v873_v19 = vmax.f32 %v296_v15, %v297_v17  ;;  %v875_v20 = vmax.f32 %v289_v16, %v290_v18 }
  0x3a   : > { %v301_v21 = vrot.slane %v873_v19, 4 }
  0x3c   : > { %v302_v22 = vsel %vm284_vm1, %v875_v20, %v301_v21 }
  0x3d   : > { %v304_v23 = vsub.f32 %v265_v4, %v302_v22 }
  0x3f   : > { %v305_v24 = vmul.f32 1.442695, %v304_v23 }
  0x41   : > { %611 = vpow2.f32 %v305_v24 }
  0x47   : > { %v612_v25 = vpop.eup %611 }
  0x48   : > { %308 = vst [vmem:[#allocation1] ss:$2 sm:$0xff] %v612_v25 }
  0x4f   : > { %v309_v37 = vld.sshfl [vmem:[#allocation1] sm:$0xff pattern:$0x75316420]  ;;  %v310_v38 = vld.sshfl [vmem:[#allocation1 + $0x8] sm:$0xff pattern:$0x75316420] }
  0x50   : > { %340 = vst [vmem:[#allocation1] ss:$2 sm:$0xff] %v338_v36  ;;  %v320_v39 = vsel %vm284_vm1, %v310_v38, 0.0  ;;  %v313_v40 = vsel %vm284_vm1, %v309_v37, 0.0  ;;  %v383_v38 = vld [vmem:[#allocation5] sm:$0x3] }
  0x51   : > { %v321_v41 = vrot.slane %v320_v39, 4  ;;  %v314_v42 = vrot.slane %v313_v40, 4 }
  0x53   : > { %v322_v43 = vadd.f32 %v321_v41, %v320_v39  ;;  %v315_v44 = vadd.f32 %v314_v42, %v313_v40 }
  0x55   : > { %v323_v45 = vrot.slane %v322_v43, 2  ;;  %v316_v46 = vrot.slane %v315_v44, 2 }
  0x57   : > { %v342_v47 = vld.sshfl [vmem:[#allocation1 + $0x8] sm:$0xff pattern:$0x75316420]  ;;  %v324_v48 = vadd.f32 %v323_v45, %v322_v43  ;;  %v341_v49 = vld.sshfl [vmem:[#allocation1] sm:$0xff pattern:$0x75316420]  ;;  %v317_v50 = vadd.f32 %v316_v46, %v315_v44 }
  0x58   : > { %v352_v51 = vsel %vm284_vm1, %v342_v47, 0.0  ;;  %v345_v53 = vsel %vm284_vm1, %v341_v49, 0.0 }
  0x59   : > { %v325_v52 = vrot.slane %v324_v48, 1  ;;  %v353_v54 = vrot.slane %v352_v51, 4  ;;  %v318_v55 = vrot.slane %v317_v50, 1  ;;  %v346_v56 = vrot.slane %v345_v53, 4 }
  0x5b   : > { %v326_v57 = vadd.f32 %v325_v52, %v324_v48  ;;  %v354_v58 = vadd.f32 %v353_v54, %v352_v51  ;;  %v319_v59 = vadd.f32 %v318_v55, %v317_v50  ;;  %v347_v60 = vadd.f32 %v346_v56, %v345_v53 }
  0x5d   : > { %613 = vlog2.f32 %v326_v57  ;;  %v355_v61 = vrot.slane %v354_v58, 2  ;;  %v348_v62 = vrot.slane %v347_v60, 2 }
  0x5e   : > { %615 = vlog2.f32 %v319_v59 }
  0x5f   : > { %v356_v0 = vadd.f32 %v355_v61, %v354_v58  ;;  %v349_v4 = vadd.f32 %v348_v62, %v347_v60 }
  0x61   : > { %v357_v9 = vrot.slane %v356_v0, 1  ;;  %v350_v13 = vrot.slane %v349_v4, 1 }
  0x63   : > { %v614_v1 = vpop.eup %613  ;;  %v358_v17 = vadd.f32 %v357_v9, %v356_v0  ;;  %v351_v23 = vadd.f32 %v350_v13, %v349_v4 }
  0x64   : > { %v616_v5 = vpop.eup %615  ;;  %v330_v8 = vmul.f32 0.6931472, %v614_v1 }
  0x65   : > { %v328_v12 = vmul.f32 0.6931472, %v616_v5 }
  0x66   : > { %v332_v16 = vadd.f32 %v330_v8, %v873_v19  ;;  %v399_v19 = vld [vmem:[#allocation6] sm:$0x3] }
  0x67   : > { %v331_v22 = vadd.f32 %v328_v12, %v875_v20 }
  0x68   : > { %v360_v28 = vsub.f32 %v332_v16, %v358_v17 }
  0x69   : > { %v359_v31 = vsub.f32 %v331_v22, %v351_v23 }
  0x98   : > { %v365_v63 = vpop.permute.xlu0 %364 }
  0x99   : > { %v367_v2 = vmul.f32 %v528_v34, %v365_v63  ;;  %v368_v3 = vmul.f32 %v529_v32, %v365_v63 }
  0x9b   : > { %v369_v6 = vsel %vm284_vm1, %v367_v2, 0.0  ;;  %v376_v7 = vsel %vm284_vm1, %v368_v3, 0.0 }
  0x9c   : > { %v370_v10 = vrot.slane %v369_v6, 4  ;;  %v377_v11 = vrot.slane %v376_v7, 4 }
  0x9e   : > { %v371_v14 = vadd.f32 %v370_v10, %v369_v6  ;;  %v378_v15 = vadd.f32 %v377_v11, %v376_v7 }
  0xa0   : > { %v372_v18 = vrot.slane %v371_v14, 2  ;;  %v379_v21 = vrot.slane %v378_v15, 2 }
  0xa2   : > { %v373_v24 = vadd.f32 %v372_v18, %v371_v14  ;;  %v380_v25 = vadd.f32 %v379_v21, %v378_v15 }
  0xa4   : > { %v374_v29 = vrot.slane %v373_v24, 1  ;;  %v381_v30 = vrot.slane %v380_v25, 1 }
  0xa6   : > { %v375_v32 = vadd.f32 %v374_v29, %v373_v24  ;;  %v382_v33 = vadd.f32 %v381_v30, %v380_v25 }
  0xa8   : > { %v385_v34 = vmul.f32 %v382_v33, %v360_v28  ;;  %v402_v35 = vrot.slane %v382_v33, 7  ;;  %v384_v20 = vmul.f32 %v375_v32, %v359_v31 }
  0xaa   : > { %v388_v36 = vrot.slane %v385_v34, 7  ;;  %v403_v37 = vsel %vm389_vm4, %v375_v32, %v402_v35 }
  0xab   : > { %v405_v39 = vsel %vm267_vm5, %v403_v37, 0.0 }
  0xac   : > { %v390_v40 = vsel %vm389_vm4, %v384_v20, %v388_v36  ;;  %v406_v41 = vadd.f32 %v405_v39, %v399_v19 }
  0xad   : > { %v392_v42 = vsel %vm267_vm5, %v390_v40, 0.0 }
  0xae   : > { %v393_v26 = vadd.f32 %v392_v42, %v383_v38  ;;  %407 = vst.msk [vmem:[#allocation6] sm:$0x3] %vm396_vm6, %v406_v41 }
  0xaf   : > { %543 = dma.vmem_to_hbm [thread:$0]  (%p901_p1), %s427_s30, 32, %s429_s7, [#allocation7]  }
  0xb0   : > { %398 = vst.msk [vmem:[#allocation5] sm:$0x3] %vm396_vm6, %v393_v26 }
  0xb1   : > { %541 = dma.vmem_to_hbm [thread:$0]  (%p901_p1), %s415_s10, 32, %s417_s13, [#allocation4]  }
  0xb2   : > { %732 = dma.done.wait (%p901_p1), [#allocation4], 32  }
  0xb3   : > { %734 = vsyncadd (%p901_p1), [#allocation4], 4294967264 }
  0xb4   : > { %736 = dma.done.wait (%p901_p1), [#allocation7], 32  }
  0xb5   : > { %738 = vsyncadd (%p901_p1), [#allocation7], 4294967264 }
  0xb6 PF: > { %s20_s20 = sadd.s32 1, %s761_s20   ;;  %s953_s15 = smov %s745_s16 }
  0xb7   : > { %p17_p2 = scmp.ge.s32.totalorder %s20_s20, 4   ;;  %s954_s16 = smov %s749_s17 }
  0xb8   : > { %s955_s17 = smov %s844_s27  ;;  %s956_s18 = smov %s757_s19 }
  0xb9   : > { %s957_s19 = smov %s959_s22  ;;  %19 = sbr.rel (!%p17_p2) target bundleno = 6 (0x6), region = 84 }
  0xbe   :  { %447 = vsyncpa [#allocation3], 1 }
  0xbf   :  { %449 = vsyncpa [#allocation3 + $0x1], 1 }
  0xc0   :  { %450 = vsyncpa [#allocation4], 1 }
  0xc1   :  { %452 = vsyncpa [#allocation4 + $0x1], 1 }
  0xc2   :  { %453 = vsyncpa [#allocation7], 1 }

</bundles_post_ra>
